<compile_context>
chip_gen: v6e
topology: v6e:2x2x1
jax: 0.10.0
libtpu: 0.0.40
codegen_flags: <defaults>
</compile_context>

<pallas_src>
import functools
import math

import jax
import jax.numpy as jnp
from jax import lax
from jax.experimental import pallas as pl
from jax.experimental.pallas import tpu as pltpu


# Fixed taps from Gaussblur.__init__, factored as (A, B, A) x (A, B, A).
_CORNER = 0.03797616
_EDGE = 0.044863533
_A = math.sqrt(_CORNER)      # A*A == corner tap
_B = _EDGE / _A              # A*B == edge tap, B*B ~= 0.053 center tap (~1e-8 off)


def _gaussblur_kernel(x_ref, o_ref, pad_ref, *, H, W):
    """One batch element per grid step.

    x_ref  : (1, C, H*W)     unpadded input block (lane axis = H*W, lane-dense)
    o_ref  : (1, 1, H*W)     blurred channel-sum plane
    pad_ref: (1, H*W + 2*W)  VMEM scratch realizing the zero padding
    """
    HW = H * W

    # Channel-sum reduction, accumulated in f32 (matches conv2d accumulation).
    x = x_ref[0].astype(jnp.float32)               # (C, HW)
    s = jnp.sum(x, axis=0, keepdims=True)          # (1, HW)

    # Zero-padded copy of s: one zero "row" (W lanes) on each side.
    pad_ref[...] = jnp.zeros_like(pad_ref)
    pad_ref[:, W:W + HW] = s

    # Column index within a row, for masking shifted reads at the W boundary.
    col = lax.broadcasted_iota(jnp.int32, (1, HW), 1) % W

    # Horizontal 3-tap pass: t[h,w] = A*s[h,w-1] + B*s[h,w] + A*s[h,w+1].
    left = jnp.where(col == 0, 0.0, pad_ref[:, W - 1:W - 1 + HW])
    right = jnp.where(col == W - 1, 0.0, pad_ref[:, W + 1:W + 1 + HW])
    t = _A * (left + right) + _B * s

    # Vertical 3-tap pass: reuse the padded scratch (its borders are still 0),
    # so the H boundary zero padding comes for free from the zeroed borders.
    pad_ref[:, W:W + HW] = t
    up = pad_ref[:, 0:HW]
    down = pad_ref[:, 2 * W:2 * W + HW]
    o_ref[0] = (_A * (up + down) + _B * t).astype(o_ref.dtype)


def gaussblur(x):
    """x: (N, C, H, W) -> (N, C, H, W); equivalent to Gaussblur(C)(x)."""
    N, C, H, W = x.shape
    HW = H * W

    # Free contiguous reshape: lane axis becomes H*W (lane-dense when H*W >= 128).
    x_flat = x.reshape(N, C, HW)

    kernel = functools.partial(_gaussblur_kernel, H=H, W=W)
    blur_flat = pl.pallas_call(
        kernel,
        out_shape=jax.ShapeDtypeStruct((N, 1, HW), x.dtype),
        grid_spec=pltpu.PrefetchScalarGridSpec(
            num_scalar_prefetch=0,
            grid=(N,),
            in_specs=[pl.BlockSpec((1, C, HW), lambda n: (n, 0, 0))],
            out_specs=pl.BlockSpec((1, 1, HW), lambda n: (n, 0, 0)),
            scratch_shapes=[pltpu.VMEM((1, HW + 2 * W), jnp.float32)],
        ),
        compiler_params=pltpu.CompilerParams(
            dimension_semantics=("parallel",)),
    )(x_flat)

    # Every output channel of F.conv2d with this weight tensor is identical:
    # broadcast outside the kernel (lazy / fusible by XLA) instead of writing
    # C identical channels from the kernel.
    blur = blur_flat.reshape(N, 1, H, W)
    return jnp.broadcast_to(blur, (N, C, H, W))


def _reference(x, kern3x3, c):
    # Reference: full conv with weights = kern expanded to (c, c, 3, 3), padding=1.
    w = jnp.broadcast_to(kern3x3, (c, c, 3, 3))
    return lax.conv_general_dilated(
        x, w, window_strides=(1, 1), padding=((1, 1), (1, 1)),
        dimension_numbers=("NCHW", "OIHW", "NCHW"))


if __name__ == "__main__":
    gauss = jnp.array(
        [[0.03797616, 0.044863533, 0.03797616],
         [0.044863533, 0.053, 0.044863533],
         [0.03797616, 0.044863533, 0.03797616]], dtype=jnp.float32)

    N, C, H, W = 2, 4, 16, 16
    key = jax.random.PRNGKey(0)
    x = jax.random.normal(key, (N, C, H, W), dtype=jnp.float32)

    out = jax.block_until_ready(gaussblur(x))
    ref = jax.block_until_ready(_reference(x, gauss, C))

    assert out.shape == (N, C, H, W)
    assert jnp.allclose(out, ref, atol=1e-4, rtol=1e-4)

    print("KERNEL_OK")
</pallas_src>

<mosaic_0001>
module attributes {stable_mosaic.version = 11 : i64} {
  func.func @_gaussblur_kernel(%arg0: i32, %arg1: memref<1x4x256xf32, #tpu.memory_space<vmem>>, %arg2: memref<1x1x256xf32, #tpu.memory_space<vmem>>, %arg3: memref<1x288xf32, #tpu.memory_space<vmem>>) attributes {dimension_semantics = [#tpu.dimension_semantics<parallel>], iteration_bounds = array<i64: 2>, scalar_prefetch = 0 : i64, scratch_operands = 1 : i64, tpu.core_type = #tpu.core_type<tc>, window_params = [{transform_indices = @transform_0, window_bounds = array<i64: 1, 4, 256>}, {transform_indices = @transform_1, window_bounds = array<i64: 1, 1, 256>}]} {
    %c0 = arith.constant 0 : index
    %c0_0 = arith.constant 0 : index
    %c0_1 = arith.constant 0 : index
    %0 = vector.load %arg1[%c0, %c0_0, %c0_1] : memref<1x4x256xf32, #tpu.memory_space<vmem>>, vector<1x4x256xf32>
    %1 = vector.shape_cast %0 : vector<1x4x256xf32> to vector<4x256xf32>
    %cst = arith.constant dense<0.000000e+00> : vector<256xf32>
    %2 = vector.multi_reduction <add>, %1, %cst [0] : vector<4x256xf32> to vector<256xf32>
    %3 = vector.shape_cast %2 : vector<256xf32> to vector<1x256xf32>
    %cst_2 = arith.constant 0.000000e+00 : f32
    %4 = vector.broadcast %cst_2 : f32 to vector<1x288xf32>
    %c0_3 = arith.constant 0 : index
    %c0_4 = arith.constant 0 : index
    %5 = vector.load %arg3[%c0_3, %c0_4] : memref<1x288xf32, #tpu.memory_space<vmem>>, vector<1x288xf32>
    tpu.vector_store %arg3[%c0_3, %c0_4], %4 {strides = array<i32>} : memref<1x288xf32, #tpu.memory_space<vmem>>, vector<1x288xf32>,
    %c0_5 = arith.constant 0 : index
    %c16 = arith.constant 16 : index
    %6 = vector.load %arg3[%c0_5, %c16] : memref<1x288xf32, #tpu.memory_space<vmem>>, vector<1x256xf32>
    tpu.vector_store %arg3[%c0_5, %c16], %3 {strides = array<i32>} : memref<1x288xf32, #tpu.memory_space<vmem>>, vector<1x256xf32>,
    %7 = tpu.iota {dimensions = array<i32: 1>} : vector<1x256xi32>
    %c16_i32 = arith.constant 16 : i32
    %c0_i32 = arith.constant 0 : i32
    %8 = arith.cmpi eq, %c16_i32, %c0_i32 : i32
    %c1_i32 = arith.constant 1 : i32
    %9 = arith.select %8, %c1_i32, %c16_i32 : i32
    %10 = vector.broadcast %9 : i32 to vector<1x256xi32>
    %11 = arith.remsi %7, %10 : vector<1x256xi32>
    %c0_i32_6 = arith.constant 0 : i32
    %12 = vector.broadcast %c0_i32_6 : i32 to vector<1x256xi32>
    %13 = arith.cmpi ne, %11, %12 : vector<1x256xi32>
    %c0_i32_7 = arith.constant 0 : i32
    %14 = vector.broadcast %c0_i32_7 : i32 to vector<1x256xi32>
    %15 = arith.cmpi slt, %11, %14 : vector<1x256xi32>
    %c0_i32_8 = arith.constant 0 : i32
    %16 = arith.cmpi slt, %9, %c0_i32_8 : i32
    %17 = vector.broadcast %16 : i1 to vector<1x256xi1>
    %18 = vector.broadcast %17 : vector<1x256xi1> to vector<1x256xi1>
    %19 = arith.xori %15, %18 : vector<1x256xi1>
    %20 = arith.andi %19, %13 : vector<1x256xi1>
    %21 = vector.broadcast %9 : i32 to vector<1x256xi32>
    %22 = arith.addi %11, %21 : vector<1x256xi32>
    %23 = arith.select %20, %22, %11 : vector<1x256xi1>, vector<1x256xi32>
    %c0_i32_9 = arith.constant 0 : i32
    %24 = vector.broadcast %c0_i32_9 : i32 to vector<1x256xi32>
    %25 = arith.cmpi eq, %23, %24 : vector<1x256xi32>
    %c0_10 = arith.constant 0 : index
    %c15 = arith.constant 15 : index
    %26 = vector.load %arg3[%c0_10, %c15] : memref<1x288xf32, #tpu.memory_space<vmem>>, vector<1x256xf32>
    %cst_11 = arith.constant 0.000000e+00 : f32
    %27 = vector.broadcast %cst_11 : f32 to vector<1x256xf32>
    %28 = arith.select %25, %27, %26 : vector<1x256xi1>, vector<1x256xf32>
    %c15_i32 = arith.constant 15 : i32
    %29 = vector.broadcast %c15_i32 : i32 to vector<1x256xi32>
    %30 = arith.cmpi eq, %23, %29 : vector<1x256xi32>
    %c0_12 = arith.constant 0 : index
    %c17 = arith.constant 17 : index
    %31 = vector.load %arg3[%c0_12, %c17] : memref<1x288xf32, #tpu.memory_space<vmem>>, vector<1x256xf32>
    %cst_13 = arith.constant 0.000000e+00 : f32
    %32 = vector.broadcast %cst_13 : f32 to vector<1x256xf32>
    %33 = arith.select %30, %32, %31 : vector<1x256xi1>, vector<1x256xf32>
    %34 = arith.addf %28, %33 : vector<1x256xf32>
    %cst_14 = arith.constant 0.194874734 : f32
    %35 = vector.broadcast %cst_14 : f32 to vector<1x256xf32>
    %36 = arith.mulf %35, %34 : vector<1x256xf32>
    %cst_15 = arith.constant 0.230217293 : f32
    %37 = vector.broadcast %cst_15 : f32 to vector<1x256xf32>
    %38 = arith.mulf %37, %3 : vector<1x256xf32>
    %39 = arith.addf %36, %38 : vector<1x256xf32>
    %c0_16 = arith.constant 0 : index
    %c16_17 = arith.constant 16 : index
    %40 = vector.load %arg3[%c0_16, %c16_17] : memref<1x288xf32, #tpu.memory_space<vmem>>, vector<1x256xf32>
    tpu.vector_store %arg3[%c0_16, %c16_17], %39 {strides = array<i32>} : memref<1x288xf32, #tpu.memory_space<vmem>>, vector<1x256xf32>,
    %c0_18 = arith.constant 0 : index
    %c0_19 = arith.constant 0 : index
    %41 = vector.load %arg3[%c0_18, %c0_19] : memref<1x288xf32, #tpu.memory_space<vmem>>, vector<1x256xf32>
    %c0_20 = arith.constant 0 : index
    %c32 = arith.constant 32 : index
    %42 = vector.load %arg3[%c0_20, %c32] : memref<1x288xf32, #tpu.memory_space<vmem>>, vector<1x256xf32>
    %43 = arith.addf %41, %42 : vector<1x256xf32>
    %cst_21 = arith.constant 0.194874734 : f32
    %44 = vector.broadcast %cst_21 : f32 to vector<1x256xf32>
    %45 = arith.mulf %44, %43 : vector<1x256xf32>
    %cst_22 = arith.constant 0.230217293 : f32
    %46 = vector.broadcast %cst_22 : f32 to vector<1x256xf32>
    %47 = arith.mulf %46, %39 : vector<1x256xf32>
    %48 = arith.addf %45, %47 : vector<1x256xf32>
    %c0_23 = arith.constant 0 : index
    %c0_24 = arith.constant 0 : index
    %c0_25 = arith.constant 0 : index
    %49 = vector.load %arg2[%c0_23, %c0_24, %c0_25] : memref<1x1x256xf32, #tpu.memory_space<vmem>>, vector<1x1x256xf32>
    %50 = vector.shape_cast %49 : vector<1x1x256xf32> to vector<1x256xf32>
    %51 = vector.shape_cast %48 : vector<1x256xf32> to vector<1x1x256xf32>
    tpu.vector_store %arg2[%c0_23, %c0_24, %c0_25], %51 {strides = array<i32>} : memref<1x1x256xf32, #tpu.memory_space<vmem>>, vector<1x1x256xf32>,
    return
  }
  func.func @transform_0(%arg0: i32) -> (i32, i32, i32) {
    %c0_i32 = arith.constant 0 : i32
    %c0_i32_0 = arith.constant 0 : i32
    %c0_i32_1 = arith.constant 0 : i32
    return %arg0, %c0_i32, %c0_i32_0 : i32, i32, i32
  }
  func.func @transform_1(%arg0: i32) -> (i32, i32, i32) {
    %c0_i32 = arith.constant 0 : i32
    %c0_i32_0 = arith.constant 0 : i32
    %c0_i32_1 = arith.constant 0 : i32
    return %arg0, %c0_i32, %c0_i32_0 : i32, i32, i32
  }
}

</mosaic_0001>

<bundles_post_ra>
// kernel: tpu_custom_call.1
= control target key start
LH: loop header
LB: loop body
LE: loop exit
PB: predicated region body
PF: predicated region fallthrough
CT: control target
= control target key end

     0   :  { %6 = vsyncpa [#allocation4], 0  ;;  %s781_s0 = inlined_call_operand.hbm [shape: f32[2,4,256], index: 0, kind: input, shape index: {}]   ;;  %s782_s1 = inlined_call_operand.hbm [shape: f32[2,1,256], index: 1, kind: output, shape index: {}]  }
   0x1   :  { %8 = vsyncpa [#allocation4 + $0x1], 0 }
   0x2   :  { %9 = vsyncpa [#allocation5], 0 }
   0x3   :  { %11 = vsyncpa [#allocation5 + $0x1], 0  ;;  %s587_s6 = smov 0   ;;  %s589_s7 = smov 0  }
   0x4   :  { %s591_s8 = smov 0   ;;  %s593_s9 = smov 0  }
   0x5 LB: > { %s608_s10 = sadd.s32 4294967295, %s567_s9   ;;  %s406_s11 = sadd.s32 4294967294, %s567_s9   ;;  %s567_s9 = sphi %s593_s9, %s807_s9   ;;  %s563_s8 = sphi %s591_s8, %s806_s8   ;;  %s559_s7 = sphi %s589_s7, %s805_s7   ;;  %s555_s6 = sphi %s587_s6, %s804_s6  }
   0x6   : > { %s612_s12 = sadd.s32 1, %s567_s9   ;;  %s24_s13 = sadd.s32 1, %s563_s8 }
   0x7   : > { %s21_s14 = ssub.s32 %s567_s9, %s612_s12  ;;  %p31_p0 = scmp.ne.s32.totalorder %s563_s8, %s559_s7 }
   0x8   : > { %p22_p1 = scmp.eq.s32.totalorder %s21_s14, 0  ;;  %p32_p2 = scmp.eq.s32.totalorder %s567_s9, 0 }
   0x9   : > { %p37_p3 = scmp.ne.s32.totalorder %s559_s7, %s555_s6  ;;  %p38_p4 = scmp.eq.s32.totalorder %s608_s10, 0 }
   0xa   : > { %s624_s15 = scalar_select %p22_p1, %s563_s8, %s24_s13  }
   0xb   : > { %p626_p5 = por %p32_p2, %p31_p0  ;;  %p630_p6 = por %p38_p4, %p37_p3 }
   0xc   : > { %p61_p7 = scmp.eq.s32.totalorder %s608_s10, 1  ;;  %p67_p8 = scmp.eq.s32.totalorder %s406_s11, 1 }
   0xd   : > { %s786_s17 = scalar_select %p630_p6, 1, 0 }
   0xe   : > { %p434_p10 = scmp.lt.s32.totalorder %s567_s9, 2  ;;  %p637_p11 = por %p61_p7, %p31_p0 }
   0xf   : > { %p641_p12 = por %p67_p8, %p37_p3  ;;  %s87_s20 = sand.u32 1, %s563_s8  }
  0x10   : > { %s787_s18 = scalar_select %p637_p11, 1, 0 }
  0x11   : > { %s788_s19 = scalar_select %p641_p12, 1, 0 }
  0x12   : > { %s420_s21 = sshll.u32 %s567_s9, 7  ;;  %s409_s22 = sshll.u32 %s87_s20, 3 }
  0x13   : > { %s650_s25 = scalar_lea.hbm %s781_s0, %s420_s21  ;;  %s91_s26 = scalar_lea.vmem [#allocation3], %s409_s22 }
  0x14   : > { %s99_s27 = sshll.u32 %s91_s26, 4  ;;  %p654_p13 = pnand %p434_p10, %p626_p5  ;;  %s658_s27 = int_to_ptr.vmem [resolvable:$true] %s99_s27 }
  0x15   : > { %s88_s29 = scalar_lea.sflag [#allocation4], %s87_s20  ;;  %s475_s30 = scalar_lea.hbm %s650_s25, 128 }
  0x16   : > { %p476_p2 = scmp.ne.s32.totalorder %s650_s25, %s475_s30  ;;  %p477_p3 = pneg %p654_p13 }
  0x17   : > { %s480_s4 = scalar_lea.hbm %s781_s0, 256  ;;  %p481_p5 = scmp.lt.s32.totalorder %s650_s25, %s781_s0 }
  0x18   : > { %p478_p4 = pnand %p477_p3, %p476_p2  ;;  %p482_p8 = scmp.lt.s32.totalorder %s480_s4, %s475_s30 }
  0x1a   : > { %p479_p7 = pneg %p478_p4  ;;  %p483_p10 = por %p482_p8, %p481_p5 }
  0x1c   : > { %p484_p9 = pnand %p483_p10, %p479_p7 }
  0x1e   : > { %487 = shalt.err (!%p484_p9)
}
  0x1f   : > { %s488_s13 = scalar_lea.vmem %s658_s27, 128  ;;  %s569_s14 = smov [#allocation3]  }
  0x20   : > { %p489_p0 = scmp.ne.s32.totalorder %s658_s27, %s488_s13  ;;  %s493_s16 = sshll.u32 %s569_s14, 4  ;;  %s494_s16 = int_to_ptr.vmem [resolvable:$false] %s493_s16 }
  0x21   : > { %s495_s20 = scalar_lea.vmem %s494_s16, 256  ;;  %p496_p4 = scmp.lt.s32.totalorder %s658_s27, %s494_s16 }
  0x22   : > { %p491_p1 = pnand %p489_p0, %p477_p3  ;;  %p497_p12 = scmp.lt.s32.totalorder %s495_s20, %s488_s13 }
  0x24   : > { %p492_p2 = pneg %p491_p1  ;;  %p498_p11 = por %p497_p12, %p496_p4 }
  0x26   : > { %p499_p6 = pnand %p498_p11, %p492_p2 }
  0x28   : > { %502 = shalt.err (!%p499_p6)
}
  0x29   : > { %429 = dma.hbm_to_vmem [thread:$0]  (!%p654_p13), %s650_s25, 128, %s658_s27, %s88_s29  }
  0x2a   : > { %p790_p9 = scmp.lt.s32.totalorder %s567_s9, 3  ;;  %p791_p7 = scmp.ge.s32.totalorder %s567_s9, 1 }
  0x2c   : > { %p105_p0 = pnand %p791_p7, %p790_p9 }
  0x2d   : > { %s685_s21 = sand.u32 (!%p105_p0), 1, %s559_s7   ;;  %p792_p6 = scmp.ne.s32.totalorder (!%p105_p0), %s786_s17, 0 }
  0x2e   : > { %108 = sbr.rel (%p105_p0) target bundleno = 602 (0x25a), region = 24  ;;  %s413_s22 = sshll.u32 (!%p105_p0), %s685_s21, 3 }
  0x2f   : > { %s111_s23 = scalar_lea.sflag (!%p105_p0), [#allocation4], %s685_s21  ;;  %s114_s24 = scalar_lea.vmem (!%p105_p0), [#allocation3], %s413_s22 }
  0x33   : > { %546 = dma.done.wait (%p792_p6), %s111_s23, 128  }
  0x34   : > { %548 = vsyncadd (%p792_p6), %s111_s23, 4294967168  ;;  %v152_v0 = vlaneseq  ;;  %v570_v1 = vmov 0.0   ;;  %vm137_vm1 = vcmask 1043456   ;;  %v133_v2 = vld [vmem:[%s114_s24] sm:$0xff]  ;;  %v571_v11 = vmov 1966171168  }
  0x35   : > { %v135_v3 = vcombine.high %v133_v2, %v133_v2  ;;  %v138_v4 = vsel %vm137_vm1, %v133_v2, 0.0  ;;  %v161_v12 = vunpack.c.l.s4 %v571_v11  ;;  %s572_s17 = smov 16   ;;  %vm177_vm4 = vcmask 130048   ;;  %s573_s25 = smov 113  }
  0x36   : > { %vm154_vm0 = vcmp.lt.s32.totalorder %v152_v0, 288  ;;  %v139_v5 = vrot.slane %v138_v4, 4  ;;  %v164_v18 = vshrl.u32 %v152_v0, 7  ;;  %vm701_vm2 = vcmp.ge.s32.totalorder %v152_v0, 16  ;;  %s574_s26 = smov 111   ;;  %s575_s27 = smov 96  }
  0x37   : > { %156 = vst.msk [vmem:[#allocation2] sm:$0x7] %vm154_vm0, %v570_v1  ;;  %v145_v6 = vsel %vm137_vm1, %v135_v3, 0.0  ;;  %v162_v17 = vunpack.c.0.s8 %v161_v12  ;;  %vm706_vm3 = vcmp.lt.s32.totalorder %v152_v0, 272  ;;  %v185_v38 = vand.u32 127, %v152_v0  ;;  %s414_s28 = sshll.u32 %s685_s21, 1 }
  0x38   : > { %v140_v7 = vadd.f32 %v139_v5, %v138_v4  ;;  %v146_v8 = vrot.slane %v145_v6, 4  ;;  %vm182_vm5 = vmand %vm701_vm2, %vm706_vm3  ;;  %v221_v31 = vsub.s32 1, %v164_v18  ;;  %v217_v32 = vsub.s32 0, %v164_v18  ;;  %s421_s29 = sshll.u32 %s608_s10, 5  ;;  %s132_s30 = scalar_lea.vmem [#allocation6], %s414_s28 }
  0x39   : > { %v695_v22 = vsub.s32 %v162_v17, %v164_v18  ;;  %v225_v36 = vsub.s32 2, %v164_v18  ;;  %v186_v39 = vadd.s32 128, %v185_v38  ;;  %v191_v42 = vand.u32 15, %v185_v38  ;;  %s336_s2 = sshll.u32 %s132_s30, 4  ;;  %s334_s5 = scalar_lea.hbm %s782_s1, %s421_s29  ;;  %s337_s2 = int_to_ptr.vmem [resolvable:$true] %s336_s2 }
  0x3a   : > { %v141_v9 = vrot.slane %v140_v7, 2  ;;  %v147_v10 = vadd.f32 %v146_v8, %v145_v6  ;;  %vm233_vm6 = vcmask 924672   ;;  %vm248_vm9 = vcmask 908288   ;;  %s322_s11 = scalar_lea.sflag [#allocation5], %s685_s21  ;;  %s503_s13 = scalar_lea.vmem %s337_s2, 32 }
  0x3b   : > { %v198_v43 = vand.u32 15, %v186_v39  ;;  %vm721_vm7 = vcmp.eq.s32.totalorder %v191_v42, 0  ;;  %vm240_vm10 = vcmp.eq.s32.totalorder %v191_v42, 15  ;;  %vm292_vm12 = vcmask 785408   ;;  %p504_p11 = scmp.ne.s32.totalorder %s337_s2, %s503_s13  ;;  %p801_p12 = scmp.ne.s32.totalorder %s787_s18, 0 }
  0x3c   : > { %v142_v13 = vadd.f32 %v141_v9, %v140_v7  ;;  %v148_v14 = vrot.slane %v147_v10, 2  ;;  %vm318_vm13 = vcmp.lt.s32.totalorder %v152_v0, 256  ;;  %s576_s10 = smov [#allocation6]  }
  0x3d   : > { %vm725_vm8 = vcmp.eq.s32.totalorder %v198_v43, 0  ;;  %vm241_vm11 = vcmp.eq.s32.totalorder %v198_v43, 15  ;;  %p505_p13 = pnand %p504_p11, %p801_p12  ;;  %s507_s14 = sshll.u32 %s576_s10, 4  ;;  %s508_s14 = int_to_ptr.vmem [resolvable:$false] %s507_s14 }
  0x3e   : > { %v143_v15 = vrot.slane %v142_v13, 1  ;;  %v149_v16 = vadd.f32 %v148_v14, %v147_v10  ;;  %s509_s16 = scalar_lea.vmem %s508_s14, 64  ;;  %p510_p3 = scmp.lt.s32.totalorder %s337_s2, %s508_s14 }
  0x3f   : > { %p506_p1 = pneg %p505_p13  ;;  %p511_p5 = scmp.lt.s32.totalorder %s509_s16, %s503_s13 }
  0x40   : > { %v144_v19 = vadd.f32 %v143_v15, %v142_v13  ;;  %v150_v20 = vrot.slane %v149_v16, 1 }
  0x41   : > { %p512_p8 = por %p511_p5, %p510_p3 }
  0x42   : > { %v151_v21 = vadd.f32 %v150_v20, %v149_v16  ;;  %v259_v58 = vmul.f32 0.2302173, %v144_v19 }
  0x43   : > { %p513_p10 = pnand %p512_p8, %p506_p1 }
  0x44   : > { %v159_v23 = vcombine.low %v144_v19, %v151_v21  ;;  %v260_v60 = vmul.f32 0.2302173, %v151_v21 }
  0x46   : > { %v166_v24 = vrot.slane %v159_v23, %v695_v22 }
  0x48   : > { %v173_v25 = vrot.slane %v166_v24, %v695_v22 }
  0x4a   : > { %174 = vrot.lane.b32.xlu0 %v173_v25, %s572_s17 }
  0xbc   : > { %v175_v28 = vpop.permute.xlu0 %174 }
  0xbd   : > { %v176_v29 = vrot.slane %v175_v28, 7 }
  0xbf   : > { %v178_v30 = vsel %vm177_vm4, %v176_v29, %v175_v28 }
  0xc0   : > { %183 = vst.msk [vmem:[#allocation2] sm:$0x7] %vm182_vm5, %v178_v30 }
  0xc7   : > { %v213_v33 = vld [vmem:[#allocation2] sm:$0x7] }
  0xc8   : > { %v222_v34 = vrot.slane %v213_v33, %v221_v31  ;;  %v218_v35 = vrot.slane %v213_v33, %v217_v32  ;;  %v226_v37 = vrot.slane %v213_v33, %v225_v36 }
  0xca   : > { %229 = vrot.lane.b32.xlu1 %v222_v34, %s573_s25  ;;  %227 = vrot.lane.b32.xlu0 %v218_v35, %s573_s25 }
  0xce   : > { %231 = vrot.lane.b32.xlu1 %v226_v37, %s573_s25  ;;  %242 = vrot.lane.b32.xlu0 %v218_v35, %s574_s26 }
  0xd2   : > { %244 = vrot.lane.b32.xlu1 %v222_v34, %s574_s26  ;;  %246 = vrot.lane.b32.xlu0 %v226_v37, %s574_s26 }
 0x13c   : > { %v230_v40 = vpop.permute.xlu1 %229  ;;  %v228_v41 = vpop.permute.xlu0 %227 }
 0x13d   : > { %v234_v48 = vsel %vm233_vm6, %v228_v41, %v230_v40 }
 0x13e   : > { %v238_v54 = vsel %vm721_vm7, 0.0, %v234_v48 }
 0x140   : > { %v232_v44 = vpop.permute.xlu1 %231  ;;  %v243_v45 = vpop.permute.xlu0 %242 }
 0x141   : > { %v235_v49 = vsel %vm233_vm6, %v230_v40, %v232_v44 }
 0x142   : > { %v239_v55 = vsel %vm725_vm8, 0.0, %v235_v49 }
 0x144   : > { %v245_v50 = vpop.permute.xlu1 %244  ;;  %v247_v51 = vpop.permute.xlu0 %246 }
 0x145   : > { %v249_v52 = vsel %vm248_vm9, %v243_v45, %v245_v50  ;;  %v250_v53 = vsel %vm248_vm9, %v245_v50, %v247_v51 }
 0x146   : > { %v253_v56 = vsel %vm240_vm10, 0.0, %v249_v52  ;;  %v254_v57 = vsel %vm241_vm11, 0.0, %v250_v53 }
 0x147   : > { %v255_v59 = vadd.f32 %v253_v56, %v238_v54  ;;  %v256_v61 = vadd.f32 %v254_v57, %v239_v55 }
 0x149   : > { %v257_v62 = vmul.f32 0.19487473, %v255_v59  ;;  %v258_v63 = vmul.f32 0.19487473, %v256_v61 }
 0x14b   : > { %v261_v1 = vadd.f32 %v259_v58, %v257_v62  ;;  %v262_v2 = vadd.f32 %v260_v60, %v258_v63 }
 0x14d   : > { %v297_v3 = vmul.f32 0.2302173, %v261_v1  ;;  %v298_v4 = vmul.f32 0.2302173, %v262_v2  ;;  %v265_v5 = vcombine.low %v261_v1, %v262_v2 }
 0x14f   : > { %v301_v6 = vcombine.low %v297_v3, %v298_v4  ;;  %v272_v7 = vrot.slane %v265_v5, %v695_v22 }
 0x151   : > { %v279_v8 = vrot.slane %v272_v7, %v695_v22  ;;  %v308_v15 = vrot.slane %v301_v6, %v695_v22 }
 0x153   : > { %280 = vrot.lane.b32.xlu1 %v279_v8, %s572_s17  ;;  %v315_v19 = vrot.slane %v308_v15, %v695_v22 }
 0x1c5   : > { %v281_v9 = vpop.permute.xlu1 %280 }
 0x1c6   : > { %v282_v10 = vrot.slane %v281_v9, 7 }
 0x1c8   : > { %v283_v11 = vsel %vm177_vm4, %v282_v10, %v281_v9 }
 0x1c9   : > { %285 = vst.msk [vmem:[#allocation2] sm:$0x7] %vm182_vm5, %v283_v11 }
 0x1d0   : > { %v287_v12 = vld [vmem:[#allocation2] sm:$0x7] }
 0x1d1   : > { %289 = vrot.lane.b32.xlu0 %v287_v12, %s575_s27  ;;  %v286_v16 = vld [vmem:[#allocation2] sm:$0x3] }
 0x243   : > { %v290_v13 = vpop.permute.xlu0 %289 }
 0x244   : > { %v291_v14 = vrot.slane %v290_v13, 1 }
 0x246   : > { %v293_v17 = vsel %vm292_vm12, %v290_v13, %v291_v14 }
 0x247   : > { %v295_v18 = vadd.f32 %v293_v17, %v286_v16 }
 0x249   : > { %v296_v20 = vmul.f32 0.19487473, %v295_v18 }
 0x24b   : > { %v317_v21 = vadd.f32 %v315_v19, %v296_v20 }
 0x24d   : > { %320 = vst.msk [vmem:[%s132_s30] sm:$0x3] %vm318_vm13, %v317_v21 }
 0x24e   : > { %516 = shalt.err (!%p513_p10)
}
 0x24f   : > { %s517_s20 = scalar_lea.hbm %s334_s5, 32  ;;  %s521_s23 = scalar_lea.hbm %s782_s1, 64 }
 0x250   : > { %p518_p2 = scmp.ne.s32.totalorder %s334_s5, %s517_s20  ;;  %p522_p7 = scmp.lt.s32.totalorder %s334_s5, %s782_s1 }
 0x251   : > { %p523_p0 = scmp.lt.s32.totalorder %s521_s23, %s517_s20 }
 0x252   : > { %p519_p4 = pnand %p518_p2, %p801_p12 }
 0x253   : > { %p524_p6 = por %p523_p0, %p522_p7 }
 0x254   : > { %p520_p9 = pneg %p519_p4 }
 0x256   : > { %p525_p11 = pnand %p524_p6, %p520_p9 }
 0x258   : > { %528 = shalt.err (!%p525_p11)
}
 0x259   : > { %424 = dma.vmem_to_hbm [thread:$0]  (%p801_p12), %s337_s2, 32, %s334_s5, %s322_s11  }
 0x25a PF: > { %s348_s25 = sand.u32 1, %s555_s6   ;;  %p802_p13 = scmp.ne.s32.totalorder %s788_s19, 0 }
 0x25b   : > { %p803_p1 = scmp.ge.s32.totalorder %s567_s9, 2  ;;  %s349_s26 = scalar_lea.sflag [#allocation5], %s348_s25 }
 0x25d   : > { %p431_p3 = pnand %p803_p1, %p802_p13 }
 0x25f   : > { %p432_p5 = pneg %p431_p3 }
 0x261   : > { %550 = dma.done.wait (%p432_p5), %s349_s26, 32  }
 0x262   : > { %552 = vsyncadd (%p432_p5), %s349_s26, 4294967264  ;;  %p14_p8 = scmp.ge.s32.totalorder %s612_s12, 4   ;;  %s804_s6 = smov %s559_s7 }
 0x263   : > { %s805_s7 = smov %s563_s8  ;;  %s806_s8 = smov %s624_s15 }
 0x264   : > { %s807_s9 = smov %s612_s12  ;;  %16 = sbr.rel (!%p14_p8) target bundleno = 5 (0x5), region = 69 }
 0x269   :  { %354 = vsyncpa [#allocation4], 1 }
 0x26a   :  { %356 = vsyncpa [#allocation4 + $0x1], 1 }
 0x26b   :  { %357 = vsyncpa [#allocation5], 1 }
 0x26c   :  { %359 = vsyncpa [#allocation5 + $0x1], 1 }

</bundles_post_ra>
